<compile_context>
chip_gen: v5e
topology: v5e:2x2
jax: 0.10.0
libtpu: 0.0.40
codegen_flags: <defaults>
</compile_context>

<pallas_src>
import jax
import jax.numpy as jnp
import numpy as np
from jax.experimental import pallas as pl
from jax.experimental.pallas import tpu as pltpu


def make_sinusoid_table(d_hid: int, n_position: int = 1000) -> jnp.ndarray:
    """Build the (n_position, d_hid) sinusoid table exactly like the PyTorch code."""
    pos = np.arange(n_position, dtype=np.float64)[:, None]            # (P, 1)
    hid = np.arange(d_hid, dtype=np.int64)[None, :]                    # (1, D)
    angle = pos / np.power(10000.0, 2.0 * (hid // 2) / float(d_hid))   # (P, D)
    table = np.array(angle, dtype=np.float64)
    table[:, 0::2] = np.sin(table[:, 0::2])
    table[:, 1::2] = np.cos(table[:, 1::2])
    return jnp.asarray(table, dtype=jnp.float32)                       # (P, D) float32


def _add_pos_kernel(x_ref, pos_ref, o_ref):
    # x_ref / o_ref: (TB, TR, L) tile for the current (row_tile, batch_tile) grid point.
    # pos_ref:       (TR, L) positional tile (identical for every batch tile).
    o_ref[...] = x_ref[...] + pos_ref[...][None]


def _target_tile_bytes() -> int:
    """Per-generation tile-size target (DMA-bound kernel: bigger tiles amortize the
    ~0.35 us/step grid overhead; v7x's faster HBM makes that overhead relatively worse)."""
    try:
        kind = jax.devices()[0].device_kind.lower()
    except Exception:
        return 2 << 20
    if "v7" in kind:
        return 5 << 20          # ~3.2 TB/s HBM, 64 MiB VMEM/TC -> 5 MiB tiles w/ headroom
    if "v6" in kind:
        return 4 << 20          # 1.4 TB/s HBM, 32 MiB scoped default comfortably raised
    return 2 << 20              # v5e / others: 2 MiB tiles already ~85% of roofline


def _choose_tiles(B: int, R: int, L: int, itemsize: int, target_bytes: int):
    """Pick (TB, TR) so TB*TR*L*itemsize ~= target_bytes.

    TR is either the full row extent or a multiple of 8; neither TR nor TB has to divide
    its array dimension (the grid uses cdiv and ragged boundary blocks)."""
    bytes_per_row = L * itemsize
    rows_target = max(1, target_bytes // bytes_per_row)
    if R <= rows_target:
        TR = R                                                   # full extent -> legal block
        TB = int(min(B, max(1, target_bytes // (R * bytes_per_row))))
    else:
        TB = 1
        TR = max(8, (rows_target // 8) * 8)                      # multiple of 8
        if TR >= R:
            TR = R
    return TB, TR


def sine_positional_encoding(x: jnp.ndarray, pos_table: jnp.ndarray,
                             *, target_tile_bytes: int | None = None) -> jnp.ndarray:
    """x: (B, S, D) float32; pos_table: (n_position, D) float32.  Returns x + pos_table[:S]."""
    B, S, D = x.shape
    assert S <= pos_table.shape[0], (
        f"seq_len {S} exceeds positional table size {pos_table.shape[0]}"
    )
    pos = pos_table[:S, :].astype(x.dtype)   # static slice == pos_table[:, :x.size(1)]
    itemsize = jnp.dtype(x.dtype).itemsize

    if target_tile_bytes is None:
        target_tile_bytes = _target_tile_bytes()

    # ---- lane-dense layout (rows R, lanes L), padding the lane axis if needed ---------
    if D % 128 == 0:
        R, L = S, D
        x3, pos2 = x, pos
        flattened = False
    else:
        N = S * D
        L = next((c for c in (1024, 512, 256, 128) if N % c == 0), 128)
        pad = (-N) % L
        R = (N + pad) // L
        x_flat = x.reshape(B, N)
        pos_flat = pos.reshape(N)
        if pad:
            # Pad up to a 128-multiple so stores are full unmasked lane-dense vst;
            # the pad is sliced back off after the kernel (cheap XLA ops).
            x_flat = jnp.pad(x_flat, ((0, 0), (0, pad)))
            pos_flat = jnp.pad(pos_flat, (0, pad))
        x3 = x_flat.reshape(B, R, L)
        pos2 = pos_flat.reshape(R, L)
        flattened = True

    TB, TR = _choose_tiles(B, R, L, itemsize, target_tile_bytes)
    num_row_tiles = pl.cdiv(R, TR)
    num_batch_tiles = pl.cdiv(B, TB)

    # v7x megacore: if everything fits one tile, split the batch axis (extent >= 2) so the
    # grid can be sharded across the two TensorCores; skip for tiny inputs.
    if (num_row_tiles == 1 and num_batch_tiles == 1 and B >= 2
            and B * R * L * itemsize > (1 << 20)):
        TB = pl.cdiv(B, 2)
        num_batch_tiles = pl.cdiv(B, TB)

    # Explicit scoped-VMEM budget: double-buffered x, out and pos tiles plus 25% headroom,
    # clamped to [32 MiB, 48 MiB] (48 MiB stays under v7x's 64 MiB physical per TC).
    tile_bytes = TB * TR * L * itemsize
    pos_tile_bytes = TR * L * itemsize
    working_set = 2 * (2 * tile_bytes + pos_tile_bytes)
    vmem_limit = int(min(48 << 20, max(32 << 20, (working_set * 5) // 4)))

    cost = pl.CostEstimate(
        flops=B * S * D,
        transcendentals=0,
        bytes_accessed=(2 * B * S * D + S * D) * itemsize,
    )

    # grid = (row_tiles, batch_tiles): batch varies fastest, so the pos tile's block index
    # (row-tile only) repeats across consecutive steps and its re-DMA is skipped.
    out = pl.pallas_call(
        _add_pos_kernel,
        out_shape=jax.ShapeDtypeStruct((B, R, L), x.dtype),
        grid=(num_row_tiles, num_batch_tiles),
        in_specs=[
            pl.BlockSpec((TB, TR, L), lambda r, b: (b, r, 0)),   # x tile
            pl.BlockSpec((TR, L), lambda r, b: (r, 0)),          # pos tile (batch-invariant)
        ],
        out_specs=pl.BlockSpec((TB, TR, L), lambda r, b: (b, r, 0)),
        compiler_params=pltpu.CompilerParams(
            dimension_semantics=("parallel", "parallel"),
            vmem_limit_bytes=vmem_limit,
        ),
        cost_estimate=cost,
    )(x3, pos2)

    if flattened:
        out = out.reshape(B, R * L)[:, : S * D].reshape(B, S, D)
    return out


def reference(x, pos_table):
    S = x.shape[1]
    return x + pos_table[None, :S, :]


if __name__ == "__main__":
    key = jax.random.PRNGKey(0)

    def run_case(B, S, D, subkey, **kw):
        x = jax.random.normal(subkey, (B, S, D), dtype=jnp.float32)
        tbl = make_sinusoid_table(d_hid=D, n_position=1000)   # (1000, D)
        out = jax.block_until_ready(sine_positional_encoding(x, tbl, **kw))
        ref = reference(x, tbl)
        assert out.shape == (B, S, D)
        assert out.dtype == jnp.float32
        np.testing.assert_allclose(np.asarray(out), np.asarray(ref), rtol=1e-6, atol=1e-6)

    # 1) small-D path (D=32 < 128): flattened lane-dense layout, N divisible by 256.
    run_case(2, 8, 32, jax.random.fold_in(key, 0))
    # 2) 128-multiple D path: keeps the (B, S, D) layout, tiles rows/batch.
    run_case(2, 16, 128, jax.random.fold_in(key, 1))
    # 3) awkward D (48): flatten + pad N up to a multiple of 128, slice the pad after.
    run_case(2, 10, 48, jax.random.fold_in(key, 2))
    # 4) forced-tiny tile: exercises ragged row tiles (cdiv grid, TR does not divide R).
    run_case(1, 40, 128, jax.random.fold_in(key, 3), target_tile_bytes=16 * 128 * 4)
    # 5) forced-tiny tile with batch tiling and a ragged last batch block (TB=2, B=3).
    run_case(3, 8, 128, jax.random.fold_in(key, 4), target_tile_bytes=2 * 8 * 128 * 4)

    print("KERNEL_OK")
</pallas_src>

<mosaic_0001>
module attributes {stable_mosaic.version = 11 : i64} {
  func.func @_add_pos_kernel(%arg0: i32, %arg1: i32, %arg2: memref<2x1x256xf32, #tpu.memory_space<vmem>>, %arg3: memref<1x256xf32, #tpu.memory_space<vmem>>, %arg4: memref<2x1x256xf32, #tpu.memory_space<vmem>>) attributes {dimension_semantics = [#tpu.dimension_semantics<parallel>, #tpu.dimension_semantics<parallel>], iteration_bounds = array<i64: 1, 1>, scalar_prefetch = 0 : i64, scratch_operands = 0 : i64, tpu.core_type = #tpu.core_type<tc>, window_params = [{transform_indices = @transform_0, window_bounds = array<i64: 2, 1, 256>}, {transform_indices = @transform_1, window_bounds = array<i64: 1, 256>}, {transform_indices = @transform_2, window_bounds = array<i64: 2, 1, 256>}]} {
    %c0 = arith.constant 0 : index
    %c0_0 = arith.constant 0 : index
    %c0_1 = arith.constant 0 : index
    %0 = vector.load %arg2[%c0, %c0_0, %c0_1] : memref<2x1x256xf32, #tpu.memory_space<vmem>>, vector<2x1x256xf32>
    %c0_2 = arith.constant 0 : index
    %c0_3 = arith.constant 0 : index
    %1 = vector.load %arg3[%c0_2, %c0_3] : memref<1x256xf32, #tpu.memory_space<vmem>>, vector<1x256xf32>
    %2 = vector.shape_cast %1 : vector<1x256xf32> to vector<1x1x256xf32>
    %3 = vector.broadcast %2 : vector<1x1x256xf32> to vector<2x1x256xf32>
    %4 = arith.addf %0, %3 : vector<2x1x256xf32>
    %c0_4 = arith.constant 0 : index
    %c0_5 = arith.constant 0 : index
    %c0_6 = arith.constant 0 : index
    %5 = vector.load %arg4[%c0_4, %c0_5, %c0_6] : memref<2x1x256xf32, #tpu.memory_space<vmem>>, vector<2x1x256xf32>
    tpu.vector_store %arg4[%c0_4, %c0_5, %c0_6], %4 {strides = array<i32>} : memref<2x1x256xf32, #tpu.memory_space<vmem>>, vector<2x1x256xf32>,
    return
  }
  func.func @transform_0(%arg0: i32, %arg1: i32) -> (i32, i32, i32) {
    %c0_i32 = arith.constant 0 : i32
    %c0_i32_0 = arith.constant 0 : i32
    return %arg1, %arg0, %c0_i32 : i32, i32, i32
  }
  func.func @transform_1(%arg0: i32, %arg1: i32) -> (i32, i32) {
    %c0_i32 = arith.constant 0 : i32
    %c0_i32_0 = arith.constant 0 : i32
    return %arg0, %c0_i32 : i32, i32
  }
  func.func @transform_2(%arg0: i32, %arg1: i32) -> (i32, i32, i32) {
    %c0_i32 = arith.constant 0 : i32
    %c0_i32_0 = arith.constant 0 : i32
    return %arg1, %arg0, %c0_i32 : i32, i32, i32
  }
}

</mosaic_0001>

<bundles_post_ra>
// kernel: tpu_custom_call.1
= control target key start
LH: loop header
LB: loop body
LE: loop exit
PB: predicated region body
PF: predicated region fallthrough
CT: control target
= control target key end

     0   :  { %7 = vsyncpa [#allocation3], 0  ;;  %s185_s0 = inlined_call_operand.hbm [shape: f32[2,1,256], index: 0, kind: input, shape index: {}]   ;;  %s186_s1 = inlined_call_operand.hbm [shape: f32[1,256], index: 1, kind: input, shape index: {}]   ;;  %s187_s2 = inlined_call_operand.hbm [shape: f32[2,1,256], index: 2, kind: output, shape index: {}]  }
   0x1   :  { %8 = vsyncpa [#allocation6], 0 }
   0x2   :  { %9 = vsyncpa [#allocation4], 0  ;;  %s14_s11 = sshll.u32 %s185_s0, 4  ;;  %s156_s12 = smov [#allocation2]   ;;  %s15_s11 = int_to_ptr.hbm [resolvable:$true] %s14_s11 }
   0x3   :  { %s16_s13 = sshll.u32 %s156_s12, 4  ;;  %s28_s16 = sshll.u32 %s186_s1, 4  ;;  %s17_s13 = int_to_ptr.vmem [resolvable:$true] %s16_s13  ;;  %s29_s16 = int_to_ptr.hbm [resolvable:$true] %s28_s16 }
   0x4   :  { %s157_s17 = smov 32   ;;  %s158_s18 = smov 2  }
   0x5   :  { %22 = dma.hbm_to_vmem [thread:$0]  %s15_s11, 64, %s17_s13, [#allocation3], %s157_s17, %s157_s17, %s158_s18  }
   0x6   :  { %s159_s19 = smov [#allocation5]  }
   0x7   :  { %s30_s20 = sshll.u32 %s159_s19, 4  ;;  %s31_s20 = int_to_ptr.vmem [resolvable:$true] %s30_s20 }
   0x8   :  { %33 = dma.hbm_to_vmem [thread:$0]  %s29_s16, 32, %s31_s20, [#allocation6]  }
   0x9   :  { %150 = dma.done.wait [#allocation3], 64  }
   0xa   :  { %151 = vsyncadd [#allocation3], 4294967232 }
   0xb   :  { %152 = dma.done.wait [#allocation6], 32  }
   0xc   :  { %153 = vsyncadd [#allocation6], 4294967264  ;;  %v47_v0 = vlaneseq  ;;  %s160_s0 = smov [#allocation7]   ;;  %s59_s1 = sshll.u32 %s187_s2, 4  ;;  %v42_v1 = vld [vmem:[#allocation2] sm:$0x3]  ;;  %s60_s1 = int_to_ptr.hbm [resolvable:$true] %s59_s1 }
   0xd   :  { %s57_s21 = sshll.u32 %s160_s0, 4  ;;  %v44_v2 = vld [vmem:[#allocation5] sm:$0x3]  ;;  %v43_v3 = vld [vmem:[#allocation2 + $0x2] sm:$0x3]  ;;  %s58_s21 = int_to_ptr.vmem [resolvable:$true] %s57_s21 }
   0xe   :  { %vm49_vm0 = vcmp.lt.s32.totalorder %v47_v0, 256  ;;  %v45_v4 = vadd.f32 %v44_v2, %v42_v1  ;;  %v46_v5 = vadd.f32 %v44_v2, %v43_v3 }
  0x10   :  { %51 = vst.msk [vmem:[#allocation7] sm:$0x3] %vm49_vm0, %v45_v4 }
  0x11   :  { %52 = vst.msk [vmem:[#allocation7 + $0x2] sm:$0x3] %vm49_vm0, %v46_v5 }
  0x12   :  { %65 = dma.vmem_to_hbm [thread:$0]  %s58_s21, 64, %s60_s1, [#allocation4], %s157_s17, %s157_s17, %s158_s18  }
  0x13   :  { %154 = dma.done.wait [#allocation4], 64  }
  0x14   :  { %155 = vsyncadd [#allocation4], 4294967232 }
  0x15   :  { %70 = vsyncpa [#allocation3], 1 }
  0x16   :  { %71 = vsyncpa [#allocation6], 1 }
  0x17   :  { %72 = vsyncpa [#allocation4], 1 }

</bundles_post_ra>
